<compile_context>
chip_gen: v6e
topology: v6e:2x2x1
jax: 0.10.0
libtpu: 0.0.40
codegen_flags: <defaults>
</compile_context>

<pallas_src>
import jax
import jax.numpy as jnp
from jax.experimental import pallas as pl
from jax.experimental.pallas import tpu as pltpu


def _clip_kernel(qmin_ref, qmax_ref, nanfill_ref, x_ref, o_ref):
    # qmin_ref / qmax_ref: (C,) f32 in SMEM (scalar-prefetched)
    # nanfill_ref:         (1,) f32 in SMEM (= max(qmax) + 100)
    # x_ref / o_ref:       (1, tile_rows, LANE) VMEM tile of the current channel
    c = pl.program_id(0)
    qmin = qmin_ref[c]
    qmax = qmax_ref[c]
    nanfill = nanfill_ref[0]

    x = x_ref[...].astype(jnp.float32)              # f32 compute (v5e-safe for bf16)
    x = jnp.where(jnp.isnan(x), nanfill, x)         # NaN -> max(qmax) + 100
    o_ref[...] = jnp.minimum(jnp.maximum(x, qmin), qmax).astype(o_ref.dtype)


def clip_pallas(x: jax.Array, qmin: jax.Array, qmax: jax.Array) -> jax.Array:
    """Apply per-channel clipping to a (C, T, H, W) tensor."""
    assert x.ndim == 4, "Clip expects a 4D tensor (C, T, H, W)"
    C, T, H, W = x.shape
    N = T * H * W
    dtype = x.dtype
    itemsize = jnp.dtype(dtype).itemsize

    # Clip bounds stay f32 on the SMEM scalar path; cast happens in-kernel.
    qmin32 = jnp.asarray(qmin, jnp.float32)
    qmax32 = jnp.asarray(qmax, jnp.float32)
    nanfill = (jnp.max(qmax32) + jnp.float32(100.0)).reshape((1,))

    # ---- lane-dense layout: (C, T, H, W) -> (C, rows_pad, LANE) ----
    LANE = 512 if N >= 512 else 128                 # multiple of 128
    rows = pl.cdiv(N, LANE)

    # Row-tile sized for ~2 MiB blocks (multiple of 8 sublanes).
    target_block_bytes = 2 * 1024 * 1024
    max_tile_rows = max(8, (target_block_bytes // (LANE * itemsize)) // 8 * 8)
    if rows <= max_tile_rows:
        tile_rows = rows                            # single block == full row dim
        rows_pad = rows
    else:
        tile_rows = max_tile_rows
        rows_pad = pl.cdiv(rows, tile_rows) * tile_rows
    n_pad = rows_pad * LANE

    xf = x.reshape(C, N)
    if n_pad != N:
        xf = jnp.pad(xf, ((0, 0), (0, n_pad - N)))  # padding is sliced off below
    x3 = xf.reshape(C, rows_pad, LANE)

    grid = (C, rows_pad // tile_rows)

    grid_spec = pltpu.PrefetchScalarGridSpec(
        num_scalar_prefetch=3,                      # qmin, qmax, nanfill in SMEM
        grid=grid,
        in_specs=[
            pl.BlockSpec((1, tile_rows, LANE),
                         lambda c, r, qmn, qmx, nf: (c, r, 0)),
        ],
        out_specs=pl.BlockSpec((1, tile_rows, LANE),
                               lambda c, r, qmn, qmx, nf: (c, r, 0)),
    )

    out3 = pl.pallas_call(
        _clip_kernel,
        grid_spec=grid_spec,
        out_shape=jax.ShapeDtypeStruct((C, rows_pad, LANE), dtype),
        compiler_params=pltpu.CompilerParams(
            dimension_semantics=("parallel", "parallel"),
        ),
    )(qmin32, qmax32, nanfill, x3)

    return out3.reshape(C, n_pad)[:, :N].reshape(C, T, H, W)


def clip_reference(x, qmin, qmax):
    """Pure-JAX reference mirroring the PyTorch forward pass."""
    qmin_b = qmin.reshape(-1, 1, 1, 1).astype(x.dtype)
    qmax_b = qmax.reshape(-1, 1, 1, 1).astype(x.dtype)
    x = jnp.where(jnp.isnan(x), jnp.max(qmax_b) + 100.0, x)
    return jnp.minimum(jnp.maximum(x, qmin_b), qmax_b)


if __name__ == "__main__":
    # Small shapes consistent with the module: (C, T, H, W)
    C, T, H, W = 4, 3, 16, 16

    key = jax.random.PRNGKey(0)
    kx, kn = jax.random.split(key)

    x = jax.random.normal(kx, (C, T, H, W), dtype=jnp.float32) * 2.0
    # Sprinkle in some NaNs to exercise the NaN-replacement path.
    nan_mask = jax.random.bernoulli(kn, p=0.05, shape=(C, T, H, W))
    x = jnp.where(nan_mask, jnp.nan, x)

    # Deterministic per-channel clip bounds (module __init__ takes lists).
    qmin = jnp.array([-1.0, -0.5, -2.0, 0.0], dtype=jnp.float32)
    qmax = jnp.array([1.0, 0.5, 2.0, 1.5], dtype=jnp.float32)

    out = clip_pallas(x, qmin, qmax)
    out = jax.block_until_ready(out)

    ref = clip_reference(x, qmin, qmax)
    assert out.shape == x.shape and out.dtype == x.dtype
    assert jnp.allclose(out, ref), "Pallas kernel mismatch vs reference"

    print("KERNEL_OK")
</pallas_src>

<mosaic_0001>
module attributes {stable_mosaic.version = 11 : i64} {
  func.func @_clip_kernel(%arg0: i32, %arg1: i32, %arg2: memref<4xf32, #tpu.memory_space<smem>>, %arg3: memref<4xf32, #tpu.memory_space<smem>>, %arg4: memref<1xf32, #tpu.memory_space<smem>>, %arg5: memref<1x2x512xf32, #tpu.memory_space<vmem>>, %arg6: memref<1x2x512xf32, #tpu.memory_space<vmem>>) attributes {dimension_semantics = [#tpu.dimension_semantics<parallel>, #tpu.dimension_semantics<parallel>], iteration_bounds = array<i64: 4, 1>, scalar_prefetch = 3 : i64, scratch_operands = 0 : i64, tpu.core_type = #tpu.core_type<tc>, window_params = [{transform_indices = @transform_0, window_bounds = array<i64: 1, 2, 512>}, {transform_indices = @transform_1, window_bounds = array<i64: 1, 2, 512>}]} {
    %0 = arith.index_cast %arg0 : i32 to index
    %1 = memref.load %arg2[%0] : memref<4xf32, #tpu.memory_space<smem>>
    %2 = arith.index_cast %arg0 : i32 to index
    %3 = memref.load %arg3[%2] : memref<4xf32, #tpu.memory_space<smem>>
    %c0 = arith.constant 0 : index
    %4 = memref.load %arg4[%c0] : memref<1xf32, #tpu.memory_space<smem>>
    %c0_0 = arith.constant 0 : index
    %c0_1 = arith.constant 0 : index
    %c0_2 = arith.constant 0 : index
    %5 = vector.load %arg5[%c0_0, %c0_1, %c0_2] : memref<1x2x512xf32, #tpu.memory_space<vmem>>, vector<1x2x512xf32>
    %6 = arith.cmpf one, %5, %5 : vector<1x2x512xf32>
    %7 = vector.broadcast %4 : f32 to vector<1x2x512xf32>
    %8 = arith.select %6, %7, %5 : vector<1x2x512xi1>, vector<1x2x512xf32>
    %9 = vector.broadcast %1 : f32 to vector<1x2x512xf32>
    %10 = arith.maximumf %8, %9 : vector<1x2x512xf32>
    %11 = vector.broadcast %3 : f32 to vector<1x2x512xf32>
    %12 = arith.minimumf %10, %11 : vector<1x2x512xf32>
    %c0_3 = arith.constant 0 : index
    %c0_4 = arith.constant 0 : index
    %c0_5 = arith.constant 0 : index
    %13 = vector.load %arg6[%c0_3, %c0_4, %c0_5] : memref<1x2x512xf32, #tpu.memory_space<vmem>>, vector<1x2x512xf32>
    tpu.vector_store %arg6[%c0_3, %c0_4, %c0_5], %12 {strides = array<i32>} : memref<1x2x512xf32, #tpu.memory_space<vmem>>, vector<1x2x512xf32>,
    return
  }
  func.func @transform_0(%arg0: i32, %arg1: i32, %arg2: memref<4xf32, #tpu.memory_space<smem>>, %arg3: memref<4xf32, #tpu.memory_space<smem>>, %arg4: memref<1xf32, #tpu.memory_space<smem>>) -> (i32, i32, i32) {
    %c0_i32 = arith.constant 0 : i32
    %c0_i32_0 = arith.constant 0 : i32
    return %arg0, %arg1, %c0_i32 : i32, i32, i32
  }
  func.func @transform_1(%arg0: i32, %arg1: i32, %arg2: memref<4xf32, #tpu.memory_space<smem>>, %arg3: memref<4xf32, #tpu.memory_space<smem>>, %arg4: memref<1xf32, #tpu.memory_space<smem>>) -> (i32, i32, i32) {
    %c0_i32 = arith.constant 0 : i32
    %c0_i32_0 = arith.constant 0 : i32
    return %arg0, %arg1, %c0_i32 : i32, i32, i32
  }
}

</mosaic_0001>

<bundles_post_ra>
// kernel: tpu_custom_call.1
= control target key start
LH: loop header
LB: loop body
LE: loop exit
PB: predicated region body
PF: predicated region fallthrough
CT: control target
= control target key end

     0   :  { %s667_s0 = inlined_call_operand.vmem [shape: f32[4], index: 0, kind: input, shape index: {}]   ;;  %s668_s3 = inlined_call_operand.hbm [shape: f32[4,2,512], index: 3, kind: input, shape index: {}]   ;;  %s669_s4 = inlined_call_operand.hbm [shape: f32[4,2,512], index: 4, kind: output, shape index: {}]   ;;  %s670_s1 = inlined_call_operand.vmem [shape: f32[4], index: 1, kind: input, shape index: {}]   ;;  %s671_s2 = inlined_call_operand.<no memory space> [shape: f32[1], index: 2, kind: input, shape index: {}]  }
   0x1   :  { %s9_s17 = sshll.u32 %s667_s0, 4  ;;  %s13_s20 = sshll.u32 %s670_s1, 4  ;;  %s10_s17 = int_to_ptr.vmem [resolvable:$true] %s9_s17  ;;  %s14_s20 = int_to_ptr.vmem [resolvable:$true] %s13_s20 }
   0x2   :  { %s359_s21 = scalar_lea.vmem %s10_s17, 16  ;;  %p364_p1 = scmp.lt.s32.totalorder %s10_s17, %s10_s17 }
   0x3   :  { %p360_p0 = scmp.ne.s32.totalorder %s10_s17, %s359_s21  ;;  %p365_p2 = scmp.lt.s32.totalorder %s359_s21, %s359_s21 }
   0x5   :  { %p366_p3 = por %p365_p2, %p364_p1 }
   0x7   :  { %p367_p4 = pnand %p366_p3, %p360_p0 }
   0x9   :  { %370 = shalt.err (!%p367_p4)  }
   0xa   :  { %s495_s22 = smov [#allocation3]   ;;  %s371_s23 = scalar_lea.vmem %s14_s20, 16 }
   0xb   :  { %12 = dma.vmem_to_smem %s10_s17, 16, %s495_s22, [#allocation2] }
   0xc   :  { %p372_p5 = scmp.ne.s32.totalorder %s14_s20, %s371_s23  ;;  %p376_p6 = scmp.lt.s32.totalorder %s14_s20, %s14_s20 }
   0xd   :  { %p377_p7 = scmp.lt.s32.totalorder %s371_s23, %s371_s23 }
   0xf   :  { %p378_p8 = por %p377_p7, %p376_p6 }
  0x11   :  { %p379_p9 = pnand %p378_p8, %p372_p5 }
  0x13   :  { %382 = shalt.err (!%p379_p9)  }
  0x14   :  { %s496_s0 = smov [#allocation4]   ;;  %17 = sst [smem:[#allocation5]] %s671_s2 }
  0x15   :  { %16 = dma.vmem_to_smem %s14_s20, 16, %s496_s0, [#allocation2] }
  0x16   :  { %461 = dma.done.wait [#allocation2], 32 }
  0x17   :  { %462 = vsyncadd [#allocation2], 4294967264 }
  0x18   :  { %19 = sfence }
  0x19   :  { %20 = vsyncpa [#allocation7], 0 }
  0x1a   :  { %22 = vsyncpa [#allocation7 + $0x1], 0 }
  0x1b   :  { %23 = vsyncpa [#allocation8], 0 }
  0x1c   :  { %25 = vsyncpa [#allocation8 + $0x1], 0  ;;  %s533_s25 = smov 0   ;;  %s535_s26 = smov 0  }
  0x1d   :  { %s537_s27 = smov 0   ;;  %s539_s28 = smov 0  }
  0x1e   :  { %s541_s29 = smov 0   ;;  %s543_s30 = smov 0  }
  0x1f LB: > { %s278_s2 = sadd.s32 4294967295, %s493_s30   ;;  %s279_s5 = sadd.s32 4294967294, %s493_s30   ;;  %s493_s30 = sphi %s543_s30, %s31_s30   ;;  %s489_s29 = sphi %s541_s29, %s682_s29   ;;  %s485_s28 = sphi %s539_s28, %s681_s28   ;;  %s481_s27 = sphi %s537_s27, %s680_s27   ;;  %s477_s26 = sphi %s535_s26, %s679_s26   ;;  %s473_s25 = sphi %s533_s25, %s678_s25  }
  0x20   : > { %s43_s6 = sadd.s32 1, %s489_s29  ;;  %s52_s7 = sadd.s32 1, %s481_s27 }
  0x21   : > { %p45_p10 = scmp.ge.s32.totalorder %s43_s6, 4  ;;  %p59_p11 = scmp.ne.s32.totalorder %s481_s27, %s477_s26 }
  0x22   : > { %p60_p12 = scmp.eq.s32.totalorder %s493_s30, 0  ;;  %p65_p13 = scmp.ne.s32.totalorder %s477_s26, %s473_s25 }
  0x23   : > { %s684_s6 = smov (%p45_p10, %s43_s6), 0  ;;  %p66_p1 = scmp.eq.s32.totalorder %s278_s2, 0 }
  0x24   : > { %p574_p0 = por %p60_p12, %p59_p11  ;;  %s47_s9 = ssub.s32 %s489_s29, %s684_s6 }
  0x25   : > { %p91_p2 = scmp.eq.s32.totalorder %s278_s2, 3  ;;  %p50_p3 = scmp.eq.s32.totalorder %s47_s9, 0 }
  0x26   : > { %p580_p4 = por %p66_p1, %p65_p13  ;;  %p97_p6 = scmp.eq.s32.totalorder %s279_s5, 3 }
  0x27   : > { %p584_p5 = por %p91_p2, %p59_p11  ;;  %p307_p8 = scmp.lt.s32.totalorder %s493_s30, 4 }
  0x28   : > { %s589_s12 = scalar_select %p50_p3, %s481_s27, %s52_s7  }
  0x29   : > { %p591_p7 = por %p97_p6, %p65_p13  ;;  %s117_s14 = sand.u32 1, %s481_s27  }
  0x2a   : > { %s282_s15 = sshll.u32 %s117_s14, 3  ;;  %s293_s16 = sshll.u32 %s489_s29, 7 }
  0x2b   : > { %s675_s13 = scalar_select %p591_p7, 1, 0 }
  0x2c   : > { %s129_s19 = scalar_lea.hbm %s668_s3, %s293_s16  ;;  %s121_s20 = scalar_lea.vmem [#allocation6], %s282_s15 }
  0x2d   : > { %s131_s21 = sshll.u32 %s121_s20, 4  ;;  %p603_p9 = pnand %p307_p8, %p574_p0  ;;  %s132_s21 = int_to_ptr.vmem [resolvable:$true] %s131_s21 }
  0x2e   : > { %p285_p10 = scmp.ge.s32.totalorder %s493_s30, 1  ;;  %p136_p11 = scmp.lt.s32.totalorder %s493_s30, 5 }
  0x2f   : > { %s118_s23 = scalar_lea.sflag [#allocation7], %s117_s14  ;;  %p385_p12 = pneg %p603_p9 }
  0x30   : > { %s396_s0 = scalar_lea.vmem %s132_s21, 128  ;;  %s497_s1 = smov [#allocation6]  }
  0x31   : > { %p397_p13 = scmp.ne.s32.totalorder %s132_s21, %s396_s0  ;;  %s401_s24 = sshll.u32 %s497_s1, 4  ;;  %s402_s24 = int_to_ptr.vmem [resolvable:$false] %s401_s24 }
  0x32   : > { %s403_s2 = scalar_lea.vmem %s402_s24, 256  ;;  %p404_p3 = scmp.lt.s32.totalorder %s132_s21, %s402_s24 }
  0x33   : > { %p399_p1 = pnand %p397_p13, %p385_p12  ;;  %p405_p6 = scmp.lt.s32.totalorder %s403_s2, %s396_s0 }
  0x35   : > { %p400_p2 = pneg %p399_p1  ;;  %p406_p0 = por %p405_p6, %p404_p3 }
  0x37   : > { %p407_p8 = pnand %p406_p0, %p400_p2 }
  0x39   : > { %410 = shalt.err (!%p407_p8)
}
  0x3a   : > { %302 = dma.hbm_to_vmem [thread:$0]  (!%p603_p9), %s129_s19, 128, %s132_s21, %s118_s23  }
  0x3b   : > { %p137_p7 = pnand %p285_p10, %p136_p11 }
  0x3c   : > { %s618_s5 = sand.u32 (!%p137_p7), 1, %s477_s26  }
  0x3d   : > { %140 = sbr.rel (%p137_p7) target bundleno = 92 (0x5c), region = 24  ;;  %s286_s7 = sshll.u32 (!%p137_p7), %s618_s5, 3 }
  0x3e   : > { %s143_s8 = scalar_lea.sflag (!%p137_p7), [#allocation7], %s618_s5  ;;  %s146_s9 = scalar_lea.vmem (!%p137_p7), [#allocation6], %s286_s7 }
  0x42   : > { %464 = dma.done.wait (%p580_p4), %s143_s8, 128  }
  0x43   : > { %466 = vsyncadd (%p580_p4), %s143_s8, 4294967168  ;;  %s167_s14 = sld [smem:[#allocation5]]  ;;  %v168_v0 = vld [vmem:[%s146_s9] sm:$0xff]  ;;  %s164_s17 = scalar_lea.vmem [#allocation9], %s286_s7 }
  0x44   : > { %s165_s15 = sld [smem:[#allocation3 + %s485_s28]]  ;;  %vm169_vm0 = vcmp.ne.f32.partialorder %v168_v0, %v168_v0  ;;  %s194_s18 = sshll.u32 %s164_s17, 4  ;;  %s195_s18 = int_to_ptr.vmem [resolvable:$true] %s194_s18 }
  0x45   : > { %s166_s16 = sld [smem:[#allocation4 + %s485_s28]]  ;;  %s294_s19 = sshll.u32 %s485_s28, 7 }
  0x46   : > { %s192_s21 = scalar_lea.hbm %s669_s4, %s294_s19  ;;  %s178_s22 = scalar_lea.sflag [#allocation8], %s618_s5 }
  0x47   : > { %s411_s23 = scalar_lea.vmem %s195_s18, 128  ;;  %s498_s0 = smov [#allocation9]  }
  0x48   : > { %p412_p4 = scmp.ne.s32.totalorder %s195_s18, %s411_s23  ;;  %s415_s1 = sshll.u32 %s498_s0, 4  ;;  %s416_s1 = int_to_ptr.vmem [resolvable:$false] %s415_s1 }
  0x49   : > { %v170_v1 = vstv %s167_s14  ;;  %s417_s24 = scalar_lea.vmem %s416_s1, 256  ;;  %p418_p10 = scmp.lt.s32.totalorder %s195_s18, %s416_s1 }
  0x4a   : > { %v172_v2 = vstv %s165_s15  ;;  %v171_v3 = vsel %vm169_vm0, %v170_v1, %v168_v0  ;;  %p413_p7 = pnand %p412_p4, %p584_p5  ;;  %p419_p11 = scmp.lt.s32.totalorder %s417_s24, %s411_s23 }
  0x4b   : > { %v174_v4 = vstv %s166_s16  ;;  %v173_v5 = vmax.f32 %v171_v3, %v172_v2 }
  0x4c   : > { %p414_p9 = pneg %p413_p7  ;;  %p420_p12 = por %p419_p11, %p418_p10 }
  0x4d   : > { %v175_v6 = vmin.f32 %v173_v5, %v174_v4 }
  0x4e   : > { %p421_p13 = pnand %p420_p12, %p414_p9 }
  0x4f   : > { %176 = vst [vmem:[%s164_s17] sm:$0xff] %v175_v6 }
  0x50   : > { %424 = shalt.err (!%p421_p13)
}
  0x51   : > { %s425_s28 = scalar_lea.hbm %s192_s21, 128  ;;  %s429_s7 = scalar_lea.hbm %s669_s4, 512 }
  0x52   : > { %p426_p1 = scmp.ne.s32.totalorder %s192_s21, %s425_s28  ;;  %p430_p6 = scmp.lt.s32.totalorder %s192_s21, %s669_s4 }
  0x53   : > { %p431_p0 = scmp.lt.s32.totalorder %s429_s7, %s425_s28 }
  0x54   : > { %p427_p2 = pnand %p426_p1, %p584_p5 }
  0x55   : > { %p432_p8 = por %p431_p0, %p430_p6 }
  0x56   : > { %p428_p3 = pneg %p427_p2 }
  0x58   : > { %p433_p4 = pnand %p432_p8, %p428_p3 }
  0x5a   : > { %436 = shalt.err (!%p433_p4)
}
  0x5b   : > { %297 = dma.vmem_to_hbm [thread:$0]  (%p584_p5), %s195_s18, 128, %s192_s21, %s178_s22  }
  0x5c PF: > { %p308_p7 = scmp.ge.s32.totalorder %s493_s30, 2  ;;  %s206_s14 = sand.u32 1, %s473_s25  }
  0x5d   : > { %p677_p9 = scmp.ne.s32.totalorder %s675_s13, 0  ;;  %s207_s15 = scalar_lea.sflag [#allocation8], %s206_s14 }
  0x5f   : > { %p304_p10 = pnand %p308_p7, %p677_p9 }
  0x61   : > { %p305_p11 = pneg %p304_p10 }
  0x63   : > { %468 = dma.done.wait (%p305_p11), %s207_s15, 128  }
  0x64   : > { %470 = vsyncadd (%p305_p11), %s207_s15, 4294967168  ;;  %s31_s30 = sadd.s32 1, %s493_s30   ;;  %s678_s25 = smov %s477_s26 }
  0x65   : > { %p28_p12 = scmp.ge.s32.totalorder %s31_s30, 6   ;;  %s679_s26 = smov %s481_s27 }
  0x66   : > { %s680_s27 = smov %s589_s12  ;;  %s681_s28 = smov %s489_s29 }
  0x67   : > { %s682_s29 = smov %s684_s6  ;;  %30 = sbr.rel (!%p28_p12) target bundleno = 31 (0x1f), region = 69 }
  0x6c   :  { %212 = vsyncpa [#allocation7], 1 }
  0x6d   :  { %214 = vsyncpa [#allocation7 + $0x1], 1 }
  0x6e   :  { %215 = vsyncpa [#allocation8], 1 }
  0x6f   :  { %217 = vsyncpa [#allocation8 + $0x1], 1 }

</bundles_post_ra>
